<compile_context>
chip_gen: v7x
topology: tpu7x:2x2x1
jax: 0.10.0
libtpu: 0.0.40
codegen_flags: <defaults>
</compile_context>

<pallas_src>
import functools
import math

import jax
import jax.numpy as jnp
from jax.experimental import pallas as pl
from jax.experimental.pallas import tpu as pltpu


def _round_up(a, b):
    return (a + b - 1) // b * b


def _sage_kernel(adj_ref, xs_ref, xd_ref, w_ref, b_ref, o_ref,
                 agg_ref, deg_ref, *, mean_aggr: bool, use_relu: bool):
    k = pl.program_id(1)

    @pl.when(k == 0)
    def _():
        agg_ref[...] = jnp.zeros_like(agg_ref)
        deg_ref[...] = jnp.zeros_like(deg_ref)

    # Stream one (tm, tk) bf16 adjacency tile; upcast once and reuse for both
    # the MXU aggregation and the fused degree row-sum.
    adj_f32 = adj_ref[...].astype(jnp.float32)
    agg_ref[...] += jnp.dot(adj_f32, xs_ref[...],
                            preferred_element_type=jnp.float32)
    if mean_aggr:
        deg_ref[...] += jnp.sum(adj_f32, axis=-1, keepdims=True)

    @pl.when(k == pl.num_programs(1) - 1)
    def _():
        agg = agg_ref[...]
        if mean_aggr:
            # Clamp degree to 1 so isolated nodes aggregate to zero
            # (matches sparse mean-reduce). approx reciprocal -> EUP slot.
            deg = jnp.maximum(deg_ref[...], 1.0)
            agg = agg * pl.reciprocal(deg, approx=True)
        # Merged matmul: [agg, x_dst] @ [W; Wr]  (doubles MXU K dimension).
        feats = jnp.concatenate([agg, xd_ref[...]], axis=-1)
        out = jnp.dot(feats, w_ref[...], preferred_element_type=jnp.float32)
        out = out + b_ref[...]
        if use_relu:
            out = jnp.maximum(out, 0.0)
        o_ref[...] = out.astype(o_ref.dtype)


def sage_conv(x, adj, weight, root_weight, bias, *, aggr="mean",
              activation=None, block_dst=256, block_src=512):
    """Fused SAGEConv forward. x:[N,Fin], adj:[N,N] dense, returns [N,Fout]."""
    if aggr not in ("sum", "mean"):
        raise ValueError(f"Expect aggregation to be 'sum' or 'mean', got {aggr}")
    use_relu = activation == "relu"

    N, f_in = x.shape
    f_out = weight.shape[1]

    # Tile sizes: multiples of 128 (MXU-friendly, lane-dense), capped by N.
    n128 = _round_up(N, 128)
    tm = _round_up(min(block_dst, n128), 128)
    tk = _round_up(min(block_src, n128), 128)
    n_pad = _round_up(N, math.lcm(tm, tk))
    f_out_pad = _round_up(f_out, 128)   # lane-dense output store

    # Pad inputs (zero rows/cols contribute nothing; padded outputs sliced off).
    x_p = jnp.pad(x, ((0, n_pad - N), (0, 0))).astype(jnp.float32)
    adj_p = jnp.pad(adj, ((0, n_pad - N), (0, n_pad - N))).astype(jnp.bfloat16)
    # NOTE: bf16 adjacency is exact for 0/1 (and small-integer) edge weights.
    w_cat = jnp.concatenate([weight, root_weight], axis=0)        # (2*Fin, Fout)
    w_cat = jnp.pad(w_cat, ((0, 0), (0, f_out_pad - f_out))).astype(jnp.float32)
    bias_p = jnp.pad(bias.reshape(1, f_out),
                     ((0, 0), (0, f_out_pad - f_out))).astype(jnp.float32)

    kernel = functools.partial(_sage_kernel,
                               mean_aggr=(aggr == "mean"),
                               use_relu=use_relu)

    grid = (n_pad // tm, n_pad // tk)

    # VMEM budget estimate (double-buffered streams + scratch), with headroom,
    # kept below the v7x 64 MiB physical ceiling.
    est = (2 * tm * tk * 2                      # adj tiles (bf16)
           + 2 * tk * f_in * 4                  # x source tiles
           + 2 * tm * f_in * 4                  # x dest tiles
           + 2 * 2 * f_in * f_out_pad * 4       # merged weights
           + 2 * f_out_pad * 4                  # bias
           + 2 * tm * f_out_pad * 4             # output tiles
           + tm * f_in * 4 + tm * 128 * 4)      # agg + deg scratch
    vmem_limit = int(min(max(2 * est, 32 * 1024 * 1024), 56 * 1024 * 1024))

    out = pl.pallas_call(
        kernel,
        out_shape=jax.ShapeDtypeStruct((n_pad, f_out_pad), jnp.float32),
        grid_spec=pltpu.PrefetchScalarGridSpec(
            num_scalar_prefetch=0,
            grid=grid,
            in_specs=[
                pl.BlockSpec((tm, tk), lambda i, k: (i, k)),        # adj tile
                pl.BlockSpec((tk, f_in), lambda i, k: (k, 0)),      # x src tile
                pl.BlockSpec((tm, f_in), lambda i, k: (i, 0)),      # x dst tile
                pl.BlockSpec((2 * f_in, f_out_pad), lambda i, k: (0, 0)),  # [W;Wr]
                pl.BlockSpec((1, f_out_pad), lambda i, k: (0, 0)),  # bias
            ],
            out_specs=pl.BlockSpec((tm, f_out_pad), lambda i, k: (i, 0)),
            scratch_shapes=[
                pltpu.VMEM((tm, f_in), jnp.float32),   # agg accumulator
                pltpu.VMEM((tm, 1), jnp.float32),      # degree accumulator
            ],
        ),
        compiler_params=pltpu.CompilerParams(
            dimension_semantics=("parallel", "arbitrary"),
            vmem_limit_bytes=vmem_limit,
        ),
    )(adj_p, x_p, x_p, w_cat, bias_p)

    return out[:N, :f_out]


def _glorot(key, shape):
    fan_in, fan_out = shape
    limit = (6.0 / (fan_in + fan_out)) ** 0.5
    return jax.random.uniform(key, shape, jnp.float32, -limit, limit)


if __name__ == "__main__":
    # Small synthetic graph consistent with the module's forward.
    N, F_IN, F_OUT = 128, 64, 32
    key = jax.random.PRNGKey(0)
    k_x, k_adj, k_w, k_wr = jax.random.split(key, 4)

    x = jax.random.normal(k_x, (N, F_IN), jnp.float32)
    # Random dense 0/1 adjacency (~5% density).
    adj = (jax.random.uniform(k_adj, (N, N)) < 0.05).astype(jnp.float32)

    # Deterministic parameter init mirroring reset_parameters():
    # glorot(weight), glorot(root_weight), zeros(bias).
    weight = _glorot(k_w, (F_IN, F_OUT))
    root_weight = _glorot(k_wr, (F_IN, F_OUT))
    bias = jnp.zeros((F_OUT,), jnp.float32)

    # feat_drop=0.0 -> dropout is identity; activation=relu for the test.
    # TODO(synk): non-zero feat_drop (dropout) left out of the kernel (identity at p=0).
    out_mean = sage_conv(x, adj, weight, root_weight, bias,
                         aggr="mean", activation="relu")
    out_mean = jax.block_until_ready(out_mean)

    out_sum = sage_conv(x, adj, weight, root_weight, bias,
                        aggr="sum", activation=None)
    out_sum = jax.block_until_ready(out_sum)

    # Pure-JAX reference checks.
    deg = jnp.clip(adj.sum(axis=1, keepdims=True), 1.0, None)
    ref_mean = (adj @ x) / deg @ weight + x @ root_weight + bias
    ref_mean = jnp.maximum(ref_mean, 0.0)
    ref_sum = (adj @ x) @ weight + x @ root_weight + bias

    assert out_mean.shape == (N, F_OUT)
    assert jnp.allclose(out_mean, ref_mean, atol=2e-3, rtol=2e-3), \
        "mean-aggr mismatch vs reference"
    assert jnp.allclose(out_sum, ref_sum, atol=2e-3, rtol=2e-3), \
        "sum-aggr mismatch vs reference"

    print("KERNEL_OK")
</pallas_src>

<mosaic_0001>
module attributes {stable_mosaic.version = 11 : i64} {
  func.func @_sage_kernel(%arg0: i32, %arg1: i32, %arg2: memref<128x128xbf16, #tpu.memory_space<vmem>>, %arg3: memref<128x64xf32, #tpu.memory_space<vmem>>, %arg4: memref<128x64xf32, #tpu.memory_space<vmem>>, %arg5: memref<128x128xf32, #tpu.memory_space<vmem>>, %arg6: memref<1x128xf32, #tpu.memory_space<vmem>>, %arg7: memref<128x128xf32, #tpu.memory_space<vmem>>, %arg8: memref<128x64xf32, #tpu.memory_space<vmem>>, %arg9: memref<128x1xf32, #tpu.memory_space<vmem>>) attributes {dimension_semantics = [#tpu.dimension_semantics<parallel>, #tpu.dimension_semantics<arbitrary>], iteration_bounds = array<i64: 1, 1>, scalar_prefetch = 0 : i64, scratch_operands = 2 : i64, tpu.core_type = #tpu.core_type<tc>, window_params = [{transform_indices = @transform_0, window_bounds = array<i64: 128, 128>}, {transform_indices = @transform_1, window_bounds = array<i64: 128, 64>}, {transform_indices = @transform_2, window_bounds = array<i64: 128, 64>}, {pipeline_mode = #tpu.pipeline_mode<synchronous>, transform_indices = @transform_3, window_bounds = array<i64: 128, 128>}, {pipeline_mode = #tpu.pipeline_mode<synchronous>, transform_indices = @transform_4, window_bounds = array<i64: 1, 128>}, {transform_indices = @transform_5, window_bounds = array<i64: 128, 128>}]} {
    %c0_i32 = arith.constant 0 : i32
    %0 = arith.cmpi eq, %arg1, %c0_i32 : i32
    %1 = arith.extui %0 : i1 to i32
    %c0_i32_0 = arith.constant 0 : i32
    %2 = arith.cmpi ne, %1, %c0_i32_0 : i32
    scf.if %2 {
      %cst_15 = arith.constant 0.000000e+00 : f32
      %18 = vector.broadcast %cst_15 : f32 to vector<128x64xf32>
      %c0_16 = arith.constant 0 : index
      %c0_17 = arith.constant 0 : index
      %19 = vector.load %arg8[%c0_16, %c0_17] : memref<128x64xf32, #tpu.memory_space<vmem>>, vector<128x64xf32>
      tpu.vector_store %arg8[%c0_16, %c0_17], %18 {strides = array<i32>} : memref<128x64xf32, #tpu.memory_space<vmem>>, vector<128x64xf32>,
      %cst_18 = arith.constant 0.000000e+00 : f32
      %20 = vector.broadcast %cst_18 : f32 to vector<128x1xf32>
      %c0_19 = arith.constant 0 : index
      %c0_20 = arith.constant 0 : index
      %21 = vector.load %arg9[%c0_19, %c0_20] : memref<128x1xf32, #tpu.memory_space<vmem>>, vector<128x1xf32>
      tpu.vector_store %arg9[%c0_19, %c0_20], %20 {strides = array<i32>} : memref<128x1xf32, #tpu.memory_space<vmem>>, vector<128x1xf32>,
    } else {
    }
    %c0 = arith.constant 0 : index
    %c0_1 = arith.constant 0 : index
    %3 = vector.load %arg2[%c0, %c0_1] : memref<128x128xbf16, #tpu.memory_space<vmem>>, vector<128x128xbf16>
    %4 = arith.extf %3 : vector<128x128xbf16> to vector<128x128xf32>
    %c0_2 = arith.constant 0 : index
    %c0_3 = arith.constant 0 : index
    %5 = vector.load %arg8[%c0_2, %c0_3] : memref<128x64xf32, #tpu.memory_space<vmem>>, vector<128x64xf32>
    %c0_4 = arith.constant 0 : index
    %c0_5 = arith.constant 0 : index
    %6 = vector.load %arg3[%c0_4, %c0_5] : memref<128x64xf32, #tpu.memory_space<vmem>>, vector<128x64xf32>
    %cst = arith.constant dense<0.000000e+00> : vector<128x64xf32>
    %7 = tpu.matmul %4, %6, %cst {dimension_numbers = #tpu.dot_dimension_numbers<[1], [0], [0], [1], [0, 0, 1, 1], [], []>} : vector<128x128xf32>, vector<128x64xf32>, vector<128x64xf32> -> vector<128x64xf32>
    %8 = arith.addf %5, %7 : vector<128x64xf32>
    %c0_6 = arith.constant 0 : index
    %c0_7 = arith.constant 0 : index
    %9 = vector.load %arg8[%c0_6, %c0_7] : memref<128x64xf32, #tpu.memory_space<vmem>>, vector<128x64xf32>
    tpu.vector_store %arg8[%c0_6, %c0_7], %8 {strides = array<i32>} : memref<128x64xf32, #tpu.memory_space<vmem>>, vector<128x64xf32>,
    %c0_8 = arith.constant 0 : index
    %c0_9 = arith.constant 0 : index
    %10 = vector.load %arg9[%c0_8, %c0_9] : memref<128x1xf32, #tpu.memory_space<vmem>>, vector<128x1xf32>
    %cst_10 = arith.constant dense<0.000000e+00> : vector<128xf32>
    %11 = vector.multi_reduction <add>, %4, %cst_10 [1] : vector<128x128xf32> to vector<128xf32>
    %12 = vector.shape_cast %11 : vector<128xf32> to vector<128x1xf32>
    %13 = arith.addf %10, %12 : vector<128x1xf32>
    %c0_11 = arith.constant 0 : index
    %c0_12 = arith.constant 0 : index
    %14 = vector.load %arg9[%c0_11, %c0_12] : memref<128x1xf32, #tpu.memory_space<vmem>>, vector<128x1xf32>
    tpu.vector_store %arg9[%c0_11, %c0_12], %13 {strides = array<i32>} : memref<128x1xf32, #tpu.memory_space<vmem>>, vector<128x1xf32>,
    %c0_i32_13 = arith.constant 0 : i32
    %15 = arith.cmpi eq, %arg1, %c0_i32_13 : i32
    %16 = arith.extui %15 : i1 to i32
    %c0_i32_14 = arith.constant 0 : i32
    %17 = arith.cmpi ne, %16, %c0_i32_14 : i32
    scf.if %17 {
      %c0_15 = arith.constant 0 : index
      %c0_16 = arith.constant 0 : index
      %18 = vector.load %arg8[%c0_15, %c0_16] : memref<128x64xf32, #tpu.memory_space<vmem>>, vector<128x64xf32>
      %c0_17 = arith.constant 0 : index
      %c0_18 = arith.constant 0 : index
      %19 = vector.load %arg9[%c0_17, %c0_18] : memref<128x1xf32, #tpu.memory_space<vmem>>, vector<128x1xf32>
      %cst_19 = arith.constant 1.000000e+00 : f32
      %20 = vector.broadcast %cst_19 : f32 to vector<128x1xf32>
      %21 = arith.maximumf %19, %20 : vector<128x1xf32>
      %22 = tpu.reciprocal %21 {approx = true} : vector<128x1xf32> -> vector<128x1xf32>
      %23 = vector.broadcast %22 : vector<128x1xf32> to vector<128x64xf32>
      %24 = arith.mulf %18, %23 : vector<128x64xf32>
      %c0_20 = arith.constant 0 : index
      %c0_21 = arith.constant 0 : index
      %25 = vector.load %arg4[%c0_20, %c0_21] : memref<128x64xf32, #tpu.memory_space<vmem>>, vector<128x64xf32>
      %26 = tpu.concatenate %24, %25 in 1 : vector<128x64xf32>, vector<128x64xf32> -> vector<128x128xf32>
      %c0_22 = arith.constant 0 : index
      %c0_23 = arith.constant 0 : index
      %27 = vector.load %arg5[%c0_22, %c0_23] : memref<128x128xf32, #tpu.memory_space<vmem>>, vector<128x128xf32>
      %cst_24 = arith.constant dense<0.000000e+00> : vector<128x128xf32>
      %28 = tpu.matmul %26, %27, %cst_24 {dimension_numbers = #tpu.dot_dimension_numbers<[1], [0], [0], [1], [0, 0, 1, 1], [], []>} : vector<128x128xf32>, vector<128x128xf32>, vector<128x128xf32> -> vector<128x128xf32>
      %c0_25 = arith.constant 0 : index
      %c0_26 = arith.constant 0 : index
      %29 = vector.load %arg6[%c0_25, %c0_26] : memref<1x128xf32, #tpu.memory_space<vmem>>, vector<1x128xf32>
      %30 = vector.broadcast %29 : vector<1x128xf32> to vector<128x128xf32>
      %31 = arith.addf %28, %30 : vector<128x128xf32>
      %cst_27 = arith.constant 0.000000e+00 : f32
      %32 = vector.broadcast %cst_27 : f32 to vector<128x128xf32>
      %33 = arith.maximumf %31, %32 : vector<128x128xf32>
      %c0_28 = arith.constant 0 : index
      %c0_29 = arith.constant 0 : index
      %34 = vector.load %arg7[%c0_28, %c0_29] : memref<128x128xf32, #tpu.memory_space<vmem>>, vector<128x128xf32>
      tpu.vector_store %arg7[%c0_28, %c0_29], %33 {strides = array<i32>} : memref<128x128xf32, #tpu.memory_space<vmem>>, vector<128x128xf32>,
    } else {
    }
    return
  }
  func.func @transform_0(%arg0: i32, %arg1: i32) -> (i32, i32) {
    %c0_i32 = arith.constant 0 : i32
    return %arg0, %arg1 : i32, i32
  }
  func.func @transform_1(%arg0: i32, %arg1: i32) -> (i32, i32) {
    %c0_i32 = arith.constant 0 : i32
    %c0_i32_0 = arith.constant 0 : i32
    return %arg1, %c0_i32 : i32, i32
  }
  func.func @transform_2(%arg0: i32, %arg1: i32) -> (i32, i32) {
    %c0_i32 = arith.constant 0 : i32
    %c0_i32_0 = arith.constant 0 : i32
    return %arg0, %c0_i32 : i32, i32
  }
  func.func @transform_3(%arg0: i32, %arg1: i32) -> (i32, i32) {
    %c0_i32 = arith.constant 0 : i32
    %c0_i32_0 = arith.constant 0 : i32
    %c0_i32_1 = arith.constant 0 : i32
    return %c0_i32, %c0_i32_0 : i32, i32
  }
  func.func @transform_4(%arg0: i32, %arg1: i32) -> (i32, i32) {
    %c0_i32 = arith.constant 0 : i32
    %c0_i32_0 = arith.constant 0 : i32
    %c0_i32_1 = arith.constant 0 : i32
    return %c0_i32, %c0_i32_0 : i32, i32
  }
  func.func @transform_5(%arg0: i32, %arg1: i32) -> (i32, i32) {
    %c0_i32 = arith.constant 0 : i32
    %c0_i32_0 = arith.constant 0 : i32
    return %arg0, %c0_i32 : i32, i32
  }
}

</mosaic_0001>

<bundles_post_ra>
// kernel: tpu_custom_call.1
= control target key start
LH: loop header
LB: loop body
LE: loop exit
PB: predicated region body
PF: predicated region fallthrough
CT: control target
= control target key end

     0   :  { %vm42_vm0 = vcmask 7168   ;;  %s1624_s0 = inlined_call_operand.vmem [shape: bf16[128,128], index: 0, kind: input, shape index: {}]   ;;  %s1625_s1 = inlined_call_operand.vmem [shape: f32[128,64], index: 1, kind: input, shape index: {}]   ;;  %s1626_s2 = inlined_call_operand.vmem [shape: f32[128,64], index: 2, kind: input, shape index: {}]   ;;  %s1627_s3 = inlined_call_operand.vmem [shape: f32[128,128], index: 3, kind: input, shape index: {}]   ;;  %s1628_s4 = inlined_call_operand.vmem [shape: f32[1,128], index: 4, kind: input, shape index: {}]   ;;  %s1629_s5 = inlined_call_operand.hbm [shape: f32[128,128], index: 5, kind: output, shape index: {}]  }
   0x1   :  { %v1280_v0 = vld [vmem:[%s1624_s0 + $0x8] sm:$0xff]   ;;  %v1285_v1 = vld [vmem:[%s1624_s0] sm:$0xff]   ;;  %v109_v8 = vld [vmem:[%s1625_s1 + $0x10] sm:$0xff] }
   0x2   :  { %v864_v2 = vunpack.c.l.bf16 %v1280_v0  ;;  %v860_v3 = vunpack.c.l.bf16 %v1285_v1  ;;  %v107_v4 = vld [vmem:[%s1625_s1] sm:$0xff]  ;;  %v865_v5 = vunpack.c.h.bf16 %v1280_v0  ;;  %v861_v6 = vunpack.c.h.bf16 %v1285_v1  ;;  %v108_v7 = vld [vmem:[%s1625_s1 + $0x8] sm:$0xff]  ;;  %v110_v9 = vld [vmem:[%s1625_s1 + $0x18] sm:$0xff] }
   0x3   :  { %v1308_v10 = vld [vmem:[%s1624_s0 + $0x10] sm:$0xff]   ;;  %v1073_v11 = vpack.c.bf16 %v108_v7, %v107_v4  ;;  %v1077_v12 = vpack.c.bf16 %v110_v9, %v109_v8  ;;  %v111_v13 = vld [vmem:[%s1625_s1 + $0x20] sm:$0xff]  ;;  %v112_v14 = vld [vmem:[%s1625_s1 + $0x28] sm:$0xff] }
   0x4   :  { %321 = vadd.xlane.f32.xlu1 %v864_v2  ;;  %317 = vadd.xlane.f32.xlu0 %v860_v3  ;;  %v869_v15 = vunpack.c.h.bf16 %v1308_v10  ;;  %v868_v16 = vunpack.c.l.bf16 %v1308_v10  ;;  %v1325_v17 = vld [vmem:[%s1624_s0 + $0x18] sm:$0xff]  }
   0x5   :  { %993 = vmatprep.mubr.f32.mxu0 %v860_v3  ;;  %1074 = vmatprep.subr.bf16.mxu0 %v1073_v11 }
   0x6   :  { %1076 = vmatpush3.bf16.msra.mxu0 %v1073_v11 }
   0x8   :  { %323 = vadd.xlane.f32.xlu1 %v865_v5  ;;  %319 = vadd.xlane.f32.xlu0 %v861_v6 }
   0x9   :  { %10 = vsyncpa [#allocation5], 0  ;;  %1078 = vmatprep.subr.bf16.mxu0 %v1077_v12  ;;  %v1081_v18 = vpack.c.bf16 %v112_v14, %v111_v13  ;;  %v1241_v19 = vmov 0.0   ;;  %v113_v20 = vld [vmem:[%s1625_s1 + $0x30] sm:$0xff]  ;;  %v114_v21 = vld [vmem:[%s1625_s1 + $0x38] sm:$0xff]  ;;  %v873_v22 = vunpack.c.h.bf16 %v1325_v17  ;;  %v872_v23 = vunpack.c.l.bf16 %v1325_v17  ;;  %s1243_s22 = smov 64  }
   0xa   :  { %45 = vst.msk [vmem:[#allocation3 + $0x10] sm:$0xff] %vm42_vm0, %v1241_v19  ;;  %43 = vst.msk [vmem:[#allocation3] sm:$0xff] %vm42_vm0, %v1241_v19  ;;  %v1374_v24 = vld [vmem:[%s1624_s0 + $0x20] sm:$0xff]   ;;  %1080 = vmatpush3.bf16.msra.mxu0 %v1077_v12  ;;  %v1085_v25 = vpack.c.bf16 %v114_v21, %v113_v20  ;;  %v116_v27 = vld [vmem:[%s1625_s1 + $0x48] sm:$0xff]  ;;  %v1242_v49 = vmov 0   ;;  %vm25_vm1 = vcmask 523264  }
   0xb   :  { %44 = vst.msk [vmem:[#allocation3 + $0x8] sm:$0xff] %vm42_vm0, %v1241_v19  ;;  %46 = vst.msk [vmem:[#allocation3 + $0x18] sm:$0xff] %vm42_vm0, %v1241_v19  ;;  %1082 = vmatprep.subr.bf16.mxu0 %v1081_v18  ;;  %v115_v26 = vld [vmem:[%s1625_s1 + $0x40] sm:$0xff]  ;;  %v877_v28 = vunpack.c.h.bf16 %v1374_v24  ;;  %v876_v29 = vunpack.c.l.bf16 %v1374_v24  ;;  %v894_v30 = vld [vmem:[%s1624_s0 + $0x28] sm:$0xff]   ;;  %1148 = vset.pattern.permute.xlu0 %v1242_v49 }
   0xc   :  { %47 = vst.msk [vmem:[#allocation3 + $0x20] sm:$0xff] %vm42_vm0, %v1241_v19  ;;  %48 = vst.msk [vmem:[#allocation3 + $0x28] sm:$0xff] %vm42_vm0, %v1241_v19  ;;  %327 = vadd.xlane.f32.xlu1 %v869_v15  ;;  %325 = vadd.xlane.f32.xlu0 %v868_v16  ;;  %v1089_v31 = vpack.c.bf16 %v116_v27, %v115_v26  ;;  %v117_v32 = vld [vmem:[%s1625_s1 + $0x50] sm:$0xff]  ;;  %v118_v33 = vld [vmem:[%s1625_s1 + $0x58] sm:$0xff]  ;;  %v881_v34 = vunpack.c.h.bf16 %v894_v30  ;;  %v880_v35 = vunpack.c.l.bf16 %v894_v30 }
   0xd   :  { %49 = vst.msk [vmem:[#allocation3 + $0x30] sm:$0xff] %vm42_vm0, %v1241_v19  ;;  %50 = vst.msk [vmem:[#allocation3 + $0x38] sm:$0xff] %vm42_vm0, %v1241_v19  ;;  %v895_v36 = vld [vmem:[%s1624_s0 + $0x30] sm:$0xff]   ;;  %v1093_v37 = vpack.c.bf16 %v118_v33, %v117_v32  ;;  %v119_v38 = vld [vmem:[%s1625_s1 + $0x60] sm:$0xff]  ;;  %1164 = vset.pattern.permute.xlu1 %v1242_v49 }
   0xe   :  { %51 = vst.msk [vmem:[#allocation3 + $0x40] sm:$0xff] %vm42_vm0, %v1241_v19  ;;  %52 = vst.msk [vmem:[#allocation3 + $0x48] sm:$0xff] %vm42_vm0, %v1241_v19  ;;  %1084 = vmatpush3.bf16.msra.mxu0 %v1081_v18  ;;  %v120_v39 = vld [vmem:[%s1625_s1 + $0x68] sm:$0xff]  ;;  %v885_v40 = vunpack.c.h.bf16 %v895_v36  ;;  %v884_v41 = vunpack.c.l.bf16 %v895_v36  ;;  %v896_v42 = vld [vmem:[%s1624_s0 + $0x38] sm:$0xff]  }
   0xf   :  { %53 = vst.msk [vmem:[#allocation3 + $0x50] sm:$0xff] %vm42_vm0, %v1241_v19  ;;  %54 = vst.msk [vmem:[#allocation3 + $0x58] sm:$0xff] %vm42_vm0, %v1241_v19  ;;  %1086 = vmatprep.subr.bf16.mxu0 %v1085_v25  ;;  %v1097_v43 = vpack.c.bf16 %v120_v39, %v119_v38  ;;  %v121_v44 = vld [vmem:[%s1625_s1 + $0x70] sm:$0xff]  ;;  %v122_v45 = vld [vmem:[%s1625_s1 + $0x78] sm:$0xff]  ;;  %v888_v46 = vunpack.c.l.bf16 %v896_v42  ;;  %v889_v47 = vunpack.c.h.bf16 %v896_v42 }
  0x10   :  { %55 = vst.msk [vmem:[#allocation3 + $0x60] sm:$0xff] %vm42_vm0, %v1241_v19  ;;  %56 = vst.msk [vmem:[#allocation3 + $0x68] sm:$0xff] %vm42_vm0, %v1241_v19  ;;  %331 = vadd.xlane.f32.xlu1 %v873_v22  ;;  %329 = vadd.xlane.f32.xlu0 %v872_v23  ;;  %v1101_v48 = vpack.c.bf16 %v122_v45, %v121_v44  ;;  %v545_v50 = vld [vmem:[%s1626_s2] sm:$0xff]  ;;  %v546_v51 = vld [vmem:[%s1626_s2 + $0x8] sm:$0xff] }
  0x11   :  { %57 = vst.msk [vmem:[#allocation3 + $0x70] sm:$0xff] %vm42_vm0, %v1241_v19  ;;  %58 = vst.msk [vmem:[#allocation3 + $0x78] sm:$0xff] %vm42_vm0, %v1241_v19  ;;  %v1143_v52 = vpack.i.bf16 %v546_v51, %v545_v50  ;;  %v549_v53 = vld [vmem:[%s1626_s2 + $0x20] sm:$0xff]  ;;  %v550_v54 = vld [vmem:[%s1626_s2 + $0x28] sm:$0xff] }
  0x12   :  { %1088 = vmatpush3.bf16.msra.mxu0 %v1085_v25  ;;  %v1154_v55 = vpack.i.bf16 %v550_v54, %v549_v53  ;;  %v641_v56 = vld [vmem:[%s1627_s3] sm:$0xff]  ;;  %v642_v57 = vld [vmem:[%s1627_s3 + $0x8] sm:$0xff]  ;;  %v643_v58 = vld [vmem:[%s1627_s3 + $0x10] sm:$0xff]  ;;  %27 = vst.msk [vmem:[#allocation2 + $0x8] sm:$0xff] %vm25_vm1, %v1241_v19 }
  0x13   :  { %1090 = vmatprep.subr.bf16.mxu0 %v1089_v31  ;;  %v1105_v59 = vpack.c.bf16 %v642_v57, %v641_v56  ;;  %v644_v60 = vld [vmem:[%s1627_s3 + $0x18] sm:$0xff]  ;;  %26 = vst.msk [vmem:[#allocation2] sm:$0xff] %vm25_vm1, %v1241_v19  ;;  %28 = vst.msk [vmem:[#allocation2 + $0x10] sm:$0xff] %vm25_vm1, %v1241_v19  ;;  %v645_v62 = vld [vmem:[%s1627_s3 + $0x20] sm:$0xff] }
  0x14   :  { %335 = vadd.xlane.f32.xlu1 %v877_v28  ;;  %333 = vadd.xlane.f32.xlu0 %v876_v29  ;;  %29 = vst.msk [vmem:[#allocation2 + $0x18] sm:$0xff] %vm25_vm1, %v1241_v19  ;;  %30 = vst.msk [vmem:[#allocation2 + $0x20] sm:$0xff] %vm25_vm1, %v1241_v19  ;;  %v1109_v61 = vpack.c.bf16 %v644_v60, %v643_v58  ;;  %v646_v63 = vld [vmem:[%s1627_s3 + $0x28] sm:$0xff]  ;;  %v647_v1 = vld [vmem:[%s1627_s3 + $0x30] sm:$0xff] }
  0x15   :  { %31 = vst.msk [vmem:[#allocation2 + $0x28] sm:$0xff] %vm25_vm1, %v1241_v19  ;;  %32 = vst.msk [vmem:[#allocation2 + $0x30] sm:$0xff] %vm25_vm1, %v1241_v19  ;;  %1106 = vmatprep.subr.bf16.mxu1 %v1105_v59  ;;  %v1113_v0 = vpack.c.bf16 %v646_v63, %v645_v62  ;;  %v649_v4 = vld [vmem:[%s1627_s3 + $0x40] sm:$0xff]  ;;  %v652_v8 = vld [vmem:[%s1627_s3 + $0x58] sm:$0xff] }
  0x16   :  { %1092 = vmatpush3.bf16.msra.mxu0 %v1089_v31  ;;  %33 = vst.msk [vmem:[#allocation2 + $0x38] sm:$0xff] %vm25_vm1, %v1241_v19  ;;  %34 = vst.msk [vmem:[#allocation2 + $0x40] sm:$0xff] %vm25_vm1, %v1241_v19  ;;  %1108 = vmatpush3.bf16.msra.mxu1 %v1105_v59  ;;  %v653_v10 = vld [vmem:[%s1627_s3 + $0x60] sm:$0xff]  ;;  %v654_v11 = vld [vmem:[%s1627_s3 + $0x68] sm:$0xff] }
  0x17   :  { %1094 = vmatprep.subr.bf16.mxu0 %v1093_v37  ;;  %35 = vst.msk [vmem:[#allocation2 + $0x48] sm:$0xff] %vm25_vm1, %v1241_v19  ;;  %36 = vst.msk [vmem:[#allocation2 + $0x50] sm:$0xff] %vm25_vm1, %v1241_v19  ;;  %1110 = vmatprep.subr.bf16.mxu1 %v1109_v61  ;;  %v1129_v12 = vpack.c.bf16 %v654_v11, %v653_v10  ;;  %v303_v13 = vld [vmem:[#allocation3 + $0x10] sm:$0xff]  ;;  %v301_v14 = vld [vmem:[#allocation3] sm:$0xff] }
  0x18   :  { %339 = vadd.xlane.f32.xlu1 %v881_v34  ;;  %337 = vadd.xlane.f32.xlu0 %v880_v35  ;;  %37 = vst.msk [vmem:[#allocation2 + $0x58] sm:$0xff] %vm25_vm1, %v1241_v19  ;;  %38 = vst.msk [vmem:[#allocation2 + $0x60] sm:$0xff] %vm25_vm1, %v1241_v19  ;;  %v302_v20 = vld [vmem:[#allocation3 + $0x8] sm:$0xff]  ;;  %v305_v26 = vld [vmem:[#allocation3 + $0x20] sm:$0xff] }
  0x19   :  { %39 = vst.msk [vmem:[#allocation2 + $0x68] sm:$0xff] %vm25_vm1, %v1241_v19  ;;  %40 = vst.msk [vmem:[#allocation2 + $0x70] sm:$0xff] %vm25_vm1, %v1241_v19  ;;  %v306_v25 = vld [vmem:[#allocation3 + $0x28] sm:$0xff]  ;;  %v308_v31 = vld [vmem:[#allocation3 + $0x38] sm:$0xff] }
  0x1a   :  { %1096 = vmatpush3.bf16.msra.mxu0 %v1093_v37  ;;  %41 = vst.msk [vmem:[#allocation2 + $0x78] sm:$0xff] %vm25_vm1, %v1241_v19  ;;  %1112 = vmatpush3.bf16.msra.mxu1 %v1109_v61  ;;  %v304_v19 = vld [vmem:[#allocation3 + $0x18] sm:$0xff]  ;;  %v307_v32 = vld [vmem:[#allocation3 + $0x30] sm:$0xff]  ;;  %v314_v60 = vld [vmem:[#allocation3 + $0x68] sm:$0xff] }
  0x1b   :  { %1098 = vmatprep.subr.bf16.mxu0 %v1097_v43  ;;  %1114 = vmatprep.subr.bf16.mxu1 %v1113_v0  ;;  %v312_v50 = vld [vmem:[#allocation3 + $0x58] sm:$0xff]  ;;  %v311_v51 = vld [vmem:[#allocation3 + $0x50] sm:$0xff]  ;;  %v313_v61 = vld [vmem:[#allocation3 + $0x60] sm:$0xff] }
  0x1c   :  { %343 = vadd.xlane.f32.xlu1 %v885_v40  ;;  %341 = vadd.xlane.f32.xlu0 %v884_v41  ;;  %v547_v58 = vld [vmem:[%s1626_s2 + $0x10] sm:$0xff]  ;;  %v548_v59 = vld [vmem:[%s1626_s2 + $0x18] sm:$0xff] }
  0x1d   :  { %v315_v10 = vld [vmem:[#allocation3 + $0x70] sm:$0xff] }
  0x1e   :  { %1100 = vmatpush3.bf16.msra.mxu0 %v1097_v43  ;;  %1116 = vmatpush3.bf16.msra.mxu1 %v1113_v0 }
  0x1f   :  { %1102 = vmatprep.subr.bf16.mxu0 %v1101_v48 }
  0x20   :  { %345 = vadd.xlane.f32.xlu0 %v888_v46  ;;  %347 = vadd.xlane.f32.xlu1 %v889_v47 }
  0x22   :  { %1104 = vmatpush3.bf16.msra.mxu0 %v1101_v48 }
  0x25   :  { %994 = vmatmul.mubr.f32.vlgmr.msra.gmra.mrb[0].mxu0 %v861_v6  ;;  %v651_v6 = vld [vmem:[%s1627_s3 + $0x50] sm:$0xff] }
  0x26   :  { %996 = vmatprep.mubr.f32.mxu0 %v864_v2  ;;  %v648_v2 = vld [vmem:[%s1627_s3 + $0x38] sm:$0xff]  ;;  %v1125_v9 = vpack.c.bf16 %v652_v8, %v651_v6 }
  0x27   :  { %v1117_v3 = vpack.c.bf16 %v648_v2, %v647_v1  ;;  %v1149_v2 = vpack.i.bf16 %v548_v59, %v547_v58  ;;  %v552_v8 = vld [vmem:[%s1626_s2 + $0x38] sm:$0xff]  ;;  %v553_v59 = vld [vmem:[%s1626_s2 + $0x40] sm:$0xff] }
  0x29   :  { %997 = vmatmul.mubr.f32.gmra.mrb[2].mxu0 %v865_v5  ;;  %1118 = vmatprep.subr.bf16.mxu1 %v1117_v3  ;;  %v650_v5 = vld [vmem:[%s1627_s3 + $0x48] sm:$0xff] }
  0x2a   :  { %999 = vmatprep.mubr.f32.mxu0 %v868_v16  ;;  %1120 = vmatpush3.bf16.msra.mxu1 %v1117_v3  ;;  %v1121_v7 = vpack.c.bf16 %v650_v5, %v649_v4  ;;  %v655_v4 = vld [vmem:[%s1627_s3 + $0x70] sm:$0xff] }
  0x2c   :  { %1122 = vmatprep.subr.bf16.mxu1 %v1121_v7 }
  0x2d   :  { %1000 = vmatmul.mubr.f32.gmra.mrb[4].mxu0 %v869_v15 }
  0x2e   :  { %1002 = vmatprep.mubr.f32.mxu0 %v872_v23  ;;  %1124 = vmatpush3.bf16.msra.mxu1 %v1121_v7  ;;  %v551_v7 = vld [vmem:[%s1626_s2 + $0x30] sm:$0xff] }
  0x2f   :  { %1126 = vmatprep.subr.bf16.mxu1 %v1125_v9 }
  0x31   :  { %1144 = vrot.lane.b32.xlu1 %v1143_v52, %s1243_s22  ;;  %1003 = vmatmul.mubr.f32.gmra.mrb[6].mxu0 %v873_v22 }
  0x32   :  { %1005 = vmatprep.mubr.f32.mxu0 %v876_v29  ;;  %1128 = vmatpush3.bf16.msra.mxu1 %v1125_v9  ;;  %v656_v9 = vld [vmem:[%s1627_s3 + $0x78] sm:$0xff] }
  0x33   :  { %1130 = vmatprep.subr.bf16.mxu1 %v1129_v12 }
  0x35   :  { %1155 = vrot.lane.b32.xlu1 %v1154_v55, %s1243_s22  ;;  %1006 = vmatmul.mubr.f32.gmra.mrb[8].mxu0 %v877_v28 }
  0x36   :  { %1008 = vmatprep.mubr.f32.mxu0 %v880_v35  ;;  %1132 = vmatpush3.bf16.msra.mxu1 %v1129_v12  ;;  %v316_v12 = vld [vmem:[#allocation3 + $0x78] sm:$0xff] }
  0x39   :  { %1009 = vmatmul.mubr.f32.gmra.mrb[10].mxu0 %v881_v34 }
  0x3a   :  { %1011 = vmatprep.mubr.f32.mxu0 %v884_v41  ;;  %v309_v41 = vld [vmem:[#allocation3 + $0x40] sm:$0xff] }
  0x3d   :  { %1012 = vmatmul.mubr.f32.gmra.mrb[12].mxu0 %v885_v40  ;;  %v310_v40 = vld [vmem:[#allocation3 + $0x48] sm:$0xff] }
  0x3e   :  { %1014 = vmatprep.mubr.f32.mxu0 %v888_v46 }
  0x41   :  { %1015 = vmatmul.mubr.f32.gmra.mrb[14].mxu0 %v889_v47 }
  0x91   :  { %v322_v15 = vpop.xlane.xlu1 %321  ;;  %v318_v16 = vpop.xlane.xlu0 %317 }
  0x92   :  { %v351_v17 = vadd.f32 %v322_v15, %v303_v13  ;;  %v349_v18 = vadd.f32 %v318_v16, %v301_v14  ;;  %v1133_v13 = vpack.c.bf16 %v656_v9, %v655_v4  ;;  %v93_v9 = vld [vmem:[#allocation2 + $0x10] sm:$0xff] }
  0x94   :  { %368 = vst.msk [vmem:[#allocation3 + $0x10] sm:$0xff] %vm42_vm0, %v351_v17  ;;  %366 = vst.msk [vmem:[#allocation3] sm:$0xff] %vm42_vm0, %v349_v18  ;;  %v1159_v18 = vpack.i.bf16 %v552_v8, %v551_v7  ;;  %1134 = vmatprep.subr.bf16.mxu1 %v1133_v13  ;;  %v94_v8 = vld [vmem:[#allocation2 + $0x18] sm:$0xff] }
  0x95   :  { %v324_v21 = vpop.xlane.xlu1 %323  ;;  %v320_v22 = vpop.xlane.xlu0 %319  ;;  %1136 = vmatpush3.bf16.msra.mxu1 %v1133_v13 }
  0x96   :  { %v352_v23 = vadd.f32 %v324_v21, %v304_v19  ;;  %v350_v24 = vadd.f32 %v320_v22, %v302_v20 }
  0x98   :  { %369 = vst.msk [vmem:[#allocation3 + $0x18] sm:$0xff] %vm42_vm0, %v352_v23  ;;  %367 = vst.msk [vmem:[#allocation3 + $0x8] sm:$0xff] %vm42_vm0, %v350_v24 }
  0x99   :  { %v328_v27 = vpop.xlane.xlu1 %327  ;;  %v326_v28 = vpop.xlane.xlu0 %325 }
  0x9a   :  { %v354_v29 = vadd.f32 %v328_v27, %v306_v25  ;;  %v353_v30 = vadd.f32 %v326_v28, %v305_v26 }
  0x9b   :  { %v401_v33 = vld [vmem:[#allocation3] sm:$0xff]  ;;  %v403_v37 = vld [vmem:[#allocation3 + $0x10] sm:$0xff] }
  0x9c   :  { %371 = vst.msk [vmem:[#allocation3 + $0x28] sm:$0xff] %vm42_vm0, %v354_v29  ;;  %370 = vst.msk [vmem:[#allocation3 + $0x20] sm:$0xff] %vm42_vm0, %v353_v30  ;;  %v417_v34 = vmax.f32 %v401_v33, 1.0  ;;  %v419_v44 = vmax.f32 %v403_v37, 1.0 }
  0x9d   :  { %v332_v35 = vpop.xlane.xlu1 %331  ;;  %v330_v36 = vpop.xlane.xlu0 %329 }
  0x9e   :  { %v356_v38 = vadd.f32 %v332_v35, %v308_v31  ;;  %v355_v39 = vadd.f32 %v330_v36, %v307_v32  ;;  %1185 = vrcp.f32 %v417_v34 }
  0x9f   :  { %v402_v42 = vld [vmem:[#allocation3 + $0x8] sm:$0xff]  ;;  %v404_v47 = vld [vmem:[#allocation3 + $0x18] sm:$0xff] }
  0xa0   :  { %373 = vst.msk [vmem:[#allocation3 + $0x38] sm:$0xff] %vm42_vm0, %v356_v38  ;;  %372 = vst.msk [vmem:[#allocation3 + $0x30] sm:$0xff] %vm42_vm0, %v355_v39  ;;  %v418_v43 = vmax.f32 %v402_v42, 1.0  ;;  %v420_v52 = vmax.f32 %v404_v47, 1.0  ;;  %v555_v47 = vld [vmem:[%s1626_s2 + $0x50] sm:$0xff] }
  0xa1   :  { %v336_v45 = vpop.xlane.xlu1 %335  ;;  %v334_v46 = vpop.xlane.xlu0 %333 }
  0xa2   :  { %v358_v48 = vadd.f32 %v336_v45, %v310_v40  ;;  %v357_v49 = vadd.f32 %v334_v46, %v309_v41  ;;  %1187 = vrcp.f32 %v418_v43 }
  0xa3   :  { %1189 = vrcp.f32 %v419_v44  ;;  %v405_v55 = vld [vmem:[#allocation3 + $0x20] sm:$0xff]  ;;  %v406_v3 = vld [vmem:[#allocation3 + $0x28] sm:$0xff] }
  0xa4   :  { %375 = vst.msk [vmem:[#allocation3 + $0x48] sm:$0xff] %vm42_vm0, %v358_v48  ;;  %374 = vst.msk [vmem:[#allocation3 + $0x40] sm:$0xff] %vm42_vm0, %v357_v49  ;;  %1191 = vrcp.f32 %v420_v52  ;;  %v421_v63 = vmax.f32 %v405_v55, 1.0  ;;  %v422_v16 = vmax.f32 %v406_v3, 1.0  ;;  %v556_v48 = vld [vmem:[%s1626_s2 + $0x58] sm:$0xff]  ;;  %v91_v3 = vld [vmem:[#allocation2] sm:$0xff] }
  0xa5   :  { %v340_v53 = vpop.xlane.xlu1 %339  ;;  %v338_v54 = vpop.xlane.xlu0 %337 }
  0xa6   :  { %v360_v56 = vadd.f32 %v340_v53, %v312_v50  ;;  %v359_v57 = vadd.f32 %v338_v54, %v311_v51  ;;  %1193 = vrcp.f32 %v421_v63  ;;  %v1170_v50 = vpack.i.bf16 %v556_v48, %v555_v47  ;;  %v559_v53 = vld [vmem:[%s1626_s2 + $0x70] sm:$0xff]  ;;  %v560_v54 = vld [vmem:[%s1626_s2 + $0x78] sm:$0xff]  ;;  %v557_v63 = vld [vmem:[%s1626_s2 + $0x60] sm:$0xff] }
  0xa7   :  { %v407_v20 = vld [vmem:[#allocation3 + $0x30] sm:$0xff]  ;;  %v408_v27 = vld [vmem:[#allocation3 + $0x38] sm:$0xff] }
  0xa8   :  { %v1186_v62 = vpop.eup %1185  ;;  %377 = vst.msk [vmem:[#allocation3 + $0x58] sm:$0xff] %vm42_vm0, %v360_v56  ;;  %376 = vst.msk [vmem:[#allocation3 + $0x50] sm:$0xff] %vm42_vm0, %v359_v57  ;;  %v423_v26 = vmax.f32 %v407_v20, 1.0  ;;  %v424_v31 = vmax.f32 %v408_v27, 1.0  ;;  %v1180_v56 = vpack.i.bf16 %v560_v54, %v559_v53  ;;  %v98_v20 = vld [vmem:[#allocation2 + $0x38] sm:$0xff]  ;;  %v99_v27 = vld [vmem:[#allocation2 + $0x40] sm:$0xff] }
  0xa9   :  { %v344_v0 = vpop.xlane.xlu1 %343  ;;  %v342_v1 = vpop.xlane.xlu0 %341  ;;  %451 = vperm.xlu0 %1148, %v1186_v62  }
  0xaa   :  { %v362_v5 = vadd.f32 %v344_v0, %v314_v60  ;;  %v361_v6 = vadd.f32 %v342_v1, %v313_v61  ;;  %v554_v60 = vld [vmem:[%s1626_s2 + $0x48] sm:$0xff] }
  0xab   :  { %v410_v11 = vld [vmem:[#allocation3 + $0x48] sm:$0xff]  ;;  %v409_v32 = vld [vmem:[#allocation3 + $0x40] sm:$0xff]  ;;  %v1165_v61 = vpack.i.bf16 %v554_v60, %v553_v59 }
  0xac   :  { %v1188_v14 = vpop.eup %1187  ;;  %379 = vst.msk [vmem:[#allocation3 + $0x68] sm:$0xff] %vm42_vm0, %v362_v5  ;;  %378 = vst.msk [vmem:[#allocation3 + $0x60] sm:$0xff] %vm42_vm0, %v361_v6  ;;  %v426_v15 = vmax.f32 %v410_v11, 1.0  ;;  %v425_v37 = vmax.f32 %v409_v32, 1.0  ;;  %v558_v0 = vld [vmem:[%s1626_s2 + $0x68] sm:$0xff]  ;;  %v102_v32 = vld [vmem:[#allocation2 + $0x58] sm:$0xff] }
  0xad   :  { %v346_v17 = vpop.xlane.xlu0 %345  ;;  %456 = vperm.xlu1 %1164, %v1188_v14   ;;  %1150 = vrot.lane.b32.xlu0 %v1149_v2, %s1243_s22  ;;  %v348_v19 = vpop.xlane.xlu1 %347  ;;  %v1175_v1 = vpack.i.bf16 %v558_v0, %v557_v63  ;;  %v92_v2 = vld [vmem:[#allocation2 + $0x8] sm:$0xff] }
  0xae   :  { %v1190_v21 = vpop.eup %1189  ;;  %v363_v22 = vadd.f32 %v346_v17, %v315_v10  ;;  %1195 = vrcp.f32 %v426_v15  ;;  %v364_v23 = vadd.f32 %v348_v19, %v316_v12  ;;  %v96_v14 = vld [vmem:[#allocation2 + $0x28] sm:$0xff]  ;;  %v95_v15 = vld [vmem:[#allocation2 + $0x20] sm:$0xff] }
  0xaf   :  { %v411_v24 = vld [vmem:[#allocation3 + $0x50] sm:$0xff]  ;;  %1197 = vrcp.f32 %v422_v16  ;;  %v1192_v28 = vpop.eup %1191  ;;  %v412_v38 = vld [vmem:[#allocation3 + $0x58] sm:$0xff] }
  0xb0   :  { %380 = vst.msk [vmem:[#allocation3 + $0x70] sm:$0xff] %vm42_vm0, %v363_v22  ;;  %v427_v25 = vmax.f32 %v411_v24, 1.0  ;;  %381 = vst.msk [vmem:[#allocation3 + $0x78] sm:$0xff] %vm42_vm0, %v364_v23  ;;  %v1194_v33 = vpop.eup %1193  ;;  %v428_v41 = vmax.f32 %v412_v38, 1.0  ;;  %v104_v38 = vld [vmem:[#allocation2 + $0x68] sm:$0xff] }
  0xb1   :  { %461 = vperm.xlu1 %1164, %v1190_v21   ;;  %1160 = vrot.lane.b32.xlu0 %v1159_v18, %s1243_s22  ;;  %v97_v21 = vld [vmem:[#allocation2 + $0x30] sm:$0xff] }
  0xb2   :  { %1199 = vrcp.f32 %v427_v25 }
  0xb3   :  { %v414_v29 = vld [vmem:[#allocation3 + $0x68] sm:$0xff]  ;;  %1201 = vrcp.f32 %v423_v26  ;;  %v413_v42 = vld [vmem:[#allocation3 + $0x60] sm:$0xff] }
  0xb4   :  { %v430_v30 = vmax.f32 %v414_v29, 1.0  ;;  %v429_v45 = vmax.f32 %v413_v42, 1.0  ;;  %v100_v26 = vld [vmem:[#allocation2 + $0x48] sm:$0xff] }
  0xb5   :  { %466 = vperm.xlu1 %1164, %v1192_v28  }
  0xb6   :  { %1203 = vrcp.f32 %v430_v30 }
  0xb7   :  { %v415_v34 = vld [vmem:[#allocation3 + $0x70] sm:$0xff]  ;;  %1205 = vrcp.f32 %v424_v31  ;;  %v416_v51 = vld [vmem:[#allocation3 + $0x78] sm:$0xff] }
  0xb8   :  { %v1196_v35 = vpop.eup %1195  ;;  %v431_v36 = vmax.f32 %v415_v34, 1.0  ;;  %v432_v55 = vmax.f32 %v416_v51, 1.0 }
  0xb9   :  { %471 = vperm.xlu1 %1164, %v1194_v33   ;;  %496 = vperm.xlu0 %1148, %v1196_v35   ;;  %v1198_v39 = vpop.eup %1197  ;;  %v101_v33 = vld [vmem:[#allocation2 + $0x50] sm:$0xff] }
  0xba   :  { %1207 = vrcp.f32 %v431_v36 }
  0xbb   :  { %1209 = vrcp.f32 %v425_v37 }
  0xbc   :  { %v1200_v40 = vpop.eup %1199  ;;  %1211 = vrcp.f32 %v428_v41 }
  0xbd   :  { %476 = vperm.xlu1 %1164, %v1198_v39   ;;  %501 = vperm.xlu0 %1148, %v1200_v40   ;;  %v1202_v43 = vpop.eup %1201  ;;  %1213 = vrcp.f32 %v429_v45  ;;  %v103_v39 = vld [vmem:[#allocation2 + $0x60] sm:$0xff]  ;;  %v105_v45 = vld [vmem:[#allocation2 + $0x70] sm:$0xff] }
  0xbe   :  { %1215 = vrcp.f32 %v432_v55 }
  0xc0   :  { %v1204_v44 = vpop.eup %1203 }
  0xc1   :  { %481 = vperm.xlu1 %1164, %v1202_v43   ;;  %516 = vperm.xlu0 %1148, %v1204_v44   ;;  %v1206_v46 = vpop.eup %1205  ;;  %v106_v44 = vld [vmem:[#allocation2 + $0x78] sm:$0xff] }
  0xc4   :  { %v1208_v49 = vpop.eup %1207 }
  0xc5   :  { %486 = vperm.xlu1 %1164, %v1206_v46   ;;  %521 = vperm.xlu0 %1148, %v1208_v49   ;;  %v1210_v52 = vpop.eup %1209 }
  0xc6   :  { %v1212_v57 = vpop.eup %1211 }
  0xc7   :  { %v1214_v58 = vpop.eup %1213 }
  0xc8   :  { %v1216_v62 = vpop.eup %1215 }
  0xc9   :  { %491 = vperm.xlu1 %1164, %v1210_v52   ;;  %1171 = vrot.lane.b32.xlu0 %v1170_v50, %s1243_s22  ;;  %v1145_v50 = vpop.permute.xlu1 %1144 }
  0xca   :  { %v1146_v54 = vunpack.i.l.bf16 %v1145_v50  ;;  %v1147_v60 = vunpack.i.h.bf16 %v1145_v50 }
  0xcd   :  { %506 = vperm.xlu1 %1164, %v1212_v57   ;;  %1181 = vrot.lane.b32.xlu0 %v1180_v56, %s1243_s22  ;;  %v1156_v52 = vpop.permute.xlu1 %1155 }
  0xd1   :  { %511 = vperm.xlu1 %1164, %v1214_v58  }
  0xd5   :  { %1166 = vrot.lane.b32.xlu1 %v1165_v61, %s1243_s22 }
  0xd9   :  { %526 = vperm.xlu1 %1164, %v1216_v62  }
  0xdd   :  { %1176 = vrot.lane.b32.xlu1 %v1175_v1, %s1243_s22 }
  0xf8   :  { %v995_v4 = vpop.f32.mrb[0].mxu0 }
  0xf9   :  { %v269_v5 = vadd.f32 %v995_v4, %v92_v2  ;;  %v189_v6 = vpop.f32.mrb[1].mxu0 }
  0xfa   :  { %v268_v7 = vadd.f32 %v189_v6, %v91_v3 }
  0xfb   :  { %286 = vst.msk [vmem:[#allocation2 + $0x8] sm:$0xff] %vm25_vm1, %v269_v5 }
  0xfc   :  { %285 = vst.msk [vmem:[#allocation2] sm:$0xff] %vm25_vm1, %v268_v7  ;;  %v998_v10 = vpop.f32.mrb[2].mxu0 }
  0xfd   :  { %v271_v11 = vadd.f32 %v998_v10, %v94_v8  ;;  %v199_v12 = vpop.f32.mrb[3].mxu0 }
  0xfe   :  { %v270_v13 = vadd.f32 %v199_v12, %v93_v9  ;;  %v1157_v12 = vunpack.i.l.bf16 %v1156_v52 }
  0xff   :  { %288 = vst.msk [vmem:[#allocation2 + $0x18] sm:$0xff] %vm25_vm1, %v271_v11 }
 0x100   :  { %287 = vst.msk [vmem:[#allocation2 + $0x10] sm:$0xff] %vm25_vm1, %v270_v13  ;;  %v1001_v16 = vpop.f32.mrb[4].mxu0 }
 0x101   :  { %v273_v17 = vadd.f32 %v1001_v16, %v96_v14  ;;  %v209_v18 = vpop.f32.mrb[5].mxu0 }
 0x102   :  { %v272_v19 = vadd.f32 %v209_v18, %v95_v15  ;;  %v386_v56 = vld [vmem:[#allocation2 + $0x8] sm:$0xff]  ;;  %v1158_v18 = vunpack.i.h.bf16 %v1156_v52 }
 0x103   :  { %290 = vst.msk [vmem:[#allocation2 + $0x28] sm:$0xff] %vm25_vm1, %v273_v17  ;;  %v385_v51 = vld [vmem:[#allocation2] sm:$0xff] }
 0x104   :  { %289 = vst.msk [vmem:[#allocation2 + $0x20] sm:$0xff] %vm25_vm1, %v272_v19  ;;  %v1004_v22 = vpop.f32.mrb[6].mxu0 }
 0x105   :  { %v275_v23 = vadd.f32 %v1004_v22, %v98_v20  ;;  %v219_v24 = vpop.f32.mrb[7].mxu0 }
 0x106   :  { %v274_v25 = vadd.f32 %v219_v24, %v97_v21  ;;  %v388_v3 = vld [vmem:[#allocation2 + $0x18] sm:$0xff] }
 0x107   :  { %292 = vst.msk [vmem:[#allocation2 + $0x38] sm:$0xff] %vm25_vm1, %v275_v23  ;;  %v387_v62 = vld [vmem:[#allocation2 + $0x10] sm:$0xff] }
 0x108   :  { %291 = vst.msk [vmem:[#allocation2 + $0x30] sm:$0xff] %vm25_vm1, %v274_v25  ;;  %v1007_v28 = vpop.f32.mrb[8].mxu0 }
 0x109   :  { %v277_v29 = vadd.f32 %v1007_v28, %v100_v26  ;;  %v229_v30 = vpop.f32.mrb[9].mxu0 }
 0x10a   :  { %v276_v31 = vadd.f32 %v229_v30, %v99_v27  ;;  %v390_v15 = vld [vmem:[#allocation2 + $0x28] sm:$0xff] }
 0x10b   :  { %294 = vst.msk [vmem:[#allocation2 + $0x48] sm:$0xff] %vm25_vm1, %v277_v29  ;;  %v389_v9 = vld [vmem:[#allocation2 + $0x20] sm:$0xff] }
 0x10c   :  { %293 = vst.msk [vmem:[#allocation2 + $0x40] sm:$0xff] %vm25_vm1, %v276_v31  ;;  %v1010_v34 = vpop.f32.mrb[10].mxu0 }
 0x10d   :  { %v279_v35 = vadd.f32 %v1010_v34, %v102_v32  ;;  %v239_v36 = vpop.f32.mrb[11].mxu0 }
 0x10e   :  { %v278_v37 = vadd.f32 %v239_v36, %v101_v33  ;;  %v392_v26 = vld [vmem:[#allocation2 + $0x38] sm:$0xff] }
 0x10f   :  { %296 = vst.msk [vmem:[#allocation2 + $0x58] sm:$0xff] %vm25_vm1, %v279_v35  ;;  %v391_v20 = vld [vmem:[#allocation2 + $0x30] sm:$0xff] }
 0x110   :  { %295 = vst.msk [vmem:[#allocation2 + $0x50] sm:$0xff] %vm25_vm1, %v278_v37  ;;  %v1013_v40 = vpop.f32.mrb[12].mxu0 }
 0x111   :  { %v281_v41 = vadd.f32 %v1013_v40, %v104_v38  ;;  %v249_v42 = vpop.f32.mrb[13].mxu0 }
 0x112   :  { %v280_v43 = vadd.f32 %v249_v42, %v103_v39  ;;  %v394_v37 = vld [vmem:[#allocation2 + $0x48] sm:$0xff] }
 0x113   :  { %298 = vst.msk [vmem:[#allocation2 + $0x68] sm:$0xff] %vm25_vm1, %v281_v41  ;;  %v393_v38 = vld [vmem:[#allocation2 + $0x40] sm:$0xff] }
 0x114   :  { %297 = vst.msk [vmem:[#allocation2 + $0x60] sm:$0xff] %vm25_vm1, %v280_v43  ;;  %v1016_v46 = vpop.f32.mrb[14].mxu0 }
 0x115   :  { %v283_v47 = vadd.f32 %v1016_v46, %v106_v44  ;;  %v259_v48 = vpop.f32.mrb[15].mxu0 }
 0x116   :  { %v282_v49 = vadd.f32 %v259_v48, %v105_v45  ;;  %v396_v45 = vld [vmem:[#allocation2 + $0x58] sm:$0xff] }
 0x117   :  { %300 = vst.msk [vmem:[#allocation2 + $0x78] sm:$0xff] %vm25_vm1, %v283_v47  ;;  %v395_v41 = vld [vmem:[#allocation2 + $0x50] sm:$0xff] }
 0x118   :  { %299 = vst.msk [vmem:[#allocation2 + $0x70] sm:$0xff] %vm25_vm1, %v282_v49 }
 0x128   :  { %v452_v53 = vpop.permute.xlu0 %451 }
 0x129   :  { %v529_v55 = vmul.f32 %v452_v53, %v385_v51 }
 0x12b   :  { %v625_v57 = vsel %vm25_vm1, %v529_v55, %v1146_v54  ;;  %v398_v54 = vld [vmem:[#allocation2 + $0x68] sm:$0xff] }
 0x12c   :  { %v457_v58 = vpop.permute.xlu1 %456  ;;  %1049 = vmatprep.mubr.f32.mxu1 %v625_v57  ;;  %v1151_v59 = vpop.permute.xlu0 %1150  ;;  %v397_v57 = vld [vmem:[#allocation2 + $0x60] sm:$0xff] }
 0x12d   :  { %v530_v61 = vmul.f32 %v457_v58, %v386_v56  ;;  %v1152_v63 = vunpack.i.l.bf16 %v1151_v59  ;;  %v1153_v4 = vunpack.i.h.bf16 %v1151_v59  ;;  %v399_v59 = vld [vmem:[#allocation2 + $0x70] sm:$0xff] }
 0x12f   :  { %v626_v0 = vsel %vm25_vm1, %v530_v61, %v1147_v60 }
 0x130   :  { %v462_v1 = vpop.permute.xlu1 %461  ;;  %1050 = vmatmul.mubr.f32.vlgmr.msra.gmra.mrb[0].mxu1 %v626_v0  ;;  %v1161_v7 = vpop.permute.xlu0 %1160  ;;  %v400_v0 = vld [vmem:[#allocation2 + $0x78] sm:$0xff] }
 0x131   :  { %v531_v2 = vmul.f32 %v462_v1, %v387_v62  ;;  %v1162_v24 = vunpack.i.l.bf16 %v1161_v7  ;;  %v1163_v29 = vunpack.i.h.bf16 %v1161_v7 }
 0x133   :  { %v627_v5 = vsel %vm25_vm1, %v531_v2, %v1152_v63 }
 0x134   :  { %v467_v6 = vpop.permute.xlu1 %466  ;;  %1052 = vmatprep.mubr.f32.mxu1 %v627_v5 }
 0x135   :  { %v532_v8 = vmul.f32 %v467_v6, %v388_v3 }
 0x137   :  { %v628_v10 = vsel %vm25_vm1, %v532_v8, %v1153_v4 }
 0x138   :  { %v472_v11 = vpop.permute.xlu1 %471  ;;  %1053 = vmatmul.mubr.f32.gmra.mrb[2].mxu1 %v628_v10  ;;  %v497_v14 = vpop.permute.xlu0 %496  ;;  %v857_v10 = vld [vmem:[%s1628_s4] ss:$0 sm:$0xff]  ;;  %s1244_s4 = smov [#allocation4]  }
 0x139   :  { %v533_v13 = vmul.f32 %v472_v11, %v389_v9  ;;  %v538_v40 = vmul.f32 %v497_v14, %v394_v37  ;;  %s846_s26 = sshll.u32 %s1244_s4, 4  ;;  %s847_s26 = int_to_ptr.vmem [resolvable:$true] %s846_s26 }
 0x13a   :  { %s1217_s27 = scalar_lea.vmem %s847_s26, 2048  ;;  %p1222_p1 = scmp.lt.s32.totalorder %s847_s26, %s847_s26 }
 0x13b   :  { %v629_v16 = vsel %vm25_vm1, %v533_v13, %v1157_v12  ;;  %p1218_p0 = scmp.ne.s32.totalorder %s847_s26, %s1217_s27  ;;  %p1223_p2 = scmp.lt.s32.totalorder %s1217_s27, %s1217_s27 }
 0x13c   :  { %v477_v17 = vpop.permute.xlu1 %476  ;;  %1055 = vmatprep.mubr.f32.mxu1 %v629_v16  ;;  %v502_v22 = vpop.permute.xlu0 %501 }
 0x13d   :  { %v534_v19 = vmul.f32 %v477_v17, %v390_v15  ;;  %v539_v48 = vmul.f32 %v502_v22, %v395_v41  ;;  %p1224_p3 = por %p1223_p2, %p1222_p1 }
 0x13f   :  { %v630_v21 = vsel %vm25_vm1, %v534_v19, %v1158_v18  ;;  %p1225_p4 = pnand %p1224_p3, %p1218_p0 }
 0x140   :  { %v482_v23 = vpop.permute.xlu1 %481  ;;  %1056 = vmatmul.mubr.f32.gmra.mrb[4].mxu1 %v630_v21  ;;  %v517_v31 = vpop.permute.xlu0 %516 }
 0x141   :  { %v535_v25 = vmul.f32 %v482_v23, %v391_v20  ;;  %v542_v58 = vmul.f32 %v517_v31, %v398_v54 }
 0x143   :  { %v631_v27 = vsel %vm25_vm1, %v535_v25, %v1162_v24 }
 0x144   :  { %v487_v28 = vpop.permute.xlu1 %486  ;;  %1058 = vmatprep.mubr.f32.mxu1 %v631_v27  ;;  %v522_v34 = vpop.permute.xlu0 %521 }
 0x145   :  { %v536_v30 = vmul.f32 %v487_v28, %v392_v26  ;;  %v543_v3 = vmul.f32 %v522_v34, %v399_v59 }
 0x147   :  { %v632_v32 = vsel %vm25_vm1, %v536_v30, %v1163_v29 }
 0x148   :  { %v492_v33 = vpop.permute.xlu1 %491  ;;  %1059 = vmatmul.mubr.f32.gmra.mrb[6].mxu1 %v632_v32  ;;  %v1172_v39 = vpop.permute.xlu0 %1171 }
 0x149   :  { %v537_v43 = vmul.f32 %v492_v33, %v393_v38  ;;  %v1173_v44 = vunpack.i.l.bf16 %v1172_v39  ;;  %v1174_v51 = vunpack.i.h.bf16 %v1172_v39 }
 0x14b   :  { %v635_v55 = vsel %vm25_vm1, %v539_v48, %v1173_v44 }
 0x14c   :  { %v507_v35 = vpop.permute.xlu1 %506  ;;  %v1182_v56 = vpop.permute.xlu0 %1181 }
 0x14d   :  { %v540_v52 = vmul.f32 %v507_v35, %v396_v45  ;;  %v1183_v62 = vunpack.i.l.bf16 %v1182_v56  ;;  %v1184_v6 = vunpack.i.h.bf16 %v1182_v56 }
 0x14f   :  { %v636_v61 = vsel %vm25_vm1, %v540_v52, %v1174_v51  ;;  %v639_v8 = vsel %vm25_vm1, %v543_v3, %v1183_v62 }
 0x150   :  { %v512_v36 = vpop.permute.xlu1 %511 }
 0x151   :  { %v541_v63 = vmul.f32 %v512_v36, %v397_v57 }
 0x154   :  { %v1167_v42 = vpop.permute.xlu1 %1166 }
 0x155   :  { %v1169_v46 = vunpack.i.h.bf16 %v1167_v42  ;;  %v1168_v47 = vunpack.i.l.bf16 %v1167_v42 }
 0x157   :  { %v633_v49 = vsel %vm25_vm1, %v537_v43, %v1168_v47  ;;  %v634_v50 = vsel %vm25_vm1, %v538_v40, %v1169_v46 }
 0x158   :  { %v527_v53 = vpop.permute.xlu1 %526  ;;  %1061 = vmatprep.mubr.f32.mxu1 %v633_v49 }
 0x159   :  { %1062 = vmatmul.mubr.f32.gmra.mrb[8].mxu1 %v634_v50  ;;  %v544_v7 = vmul.f32 %v527_v53, %v400_v0 }
 0x15a   :  { %1064 = vmatprep.mubr.f32.mxu1 %v635_v55 }
 0x15b   :  { %v640_v9 = vsel %vm25_vm1, %v544_v7, %v1184_v6 }
 0x15c   :  { %v1177_v60 = vpop.permute.xlu1 %1176 }
 0x15d   :  { %v1179_v1 = vunpack.i.h.bf16 %v1177_v60  ;;  %v1178_v2 = vunpack.i.l.bf16 %v1177_v60  ;;  %1065 = vmatmul.mubr.f32.gmra.mrb[10].mxu1 %v636_v61 }
 0x15f   :  { %v637_v4 = vsel %vm25_vm1, %v541_v63, %v1178_v2  ;;  %v638_v5 = vsel %vm25_vm1, %v542_v58, %v1179_v1 }
 0x160   :  { %1067 = vmatprep.mubr.f32.mxu1 %v637_v4 }
 0x161   :  { %1068 = vmatmul.mubr.f32.gmra.mrb[12].mxu1 %v638_v5 }
 0x162   :  { %1070 = vmatprep.mubr.f32.mxu1 %v639_v8 }
 0x165   :  { %1071 = vmatmul.mubr.f32.gmra.mrb[14].mxu1 %v640_v9 }
 0x203   :  { %v1051_v11 = vpop.f32.mrb[0].mxu1 }
 0x204   :  { %v736_v12 = vadd.f32 %v1051_v11, %v857_v10  ;;  %v730_v13 = vpop.f32.mrb[1].mxu1 }
 0x205   :  { %v731_v14 = vadd.f32 %v857_v10, %v730_v13 }
 0x206   :  { %v810_v15 = vmax.f32 %v736_v12, 0.0 }
 0x207   :  { %v809_v16 = vmax.f32 %v731_v14, 0.0 }
 0x208   :  { %826 = vst [vmem:[#allocation4 + $0x8] sm:$0xff] %v810_v15 }
 0x209   :  { %825 = vst [vmem:[#allocation4] sm:$0xff] %v809_v16 }
 0x20b   :  { %v1054_v17 = vpop.f32.mrb[2].mxu1 }
 0x20c   :  { %v746_v18 = vadd.f32 %v1054_v17, %v857_v10  ;;  %v740_v19 = vpop.f32.mrb[3].mxu1 }
 0x20d   :  { %v741_v20 = vadd.f32 %v857_v10, %v740_v19 }
 0x20e   :  { %v812_v21 = vmax.f32 %v746_v18, 0.0 }
 0x20f   :  { %v811_v22 = vmax.f32 %v741_v20, 0.0 }
 0x210   :  { %828 = vst [vmem:[#allocation4 + $0x18] sm:$0xff] %v812_v21 }
 0x211   :  { %827 = vst [vmem:[#allocation4 + $0x10] sm:$0xff] %v811_v22 }
 0x213   :  { %v1057_v23 = vpop.f32.mrb[4].mxu1 }
 0x214   :  { %v756_v24 = vadd.f32 %v1057_v23, %v857_v10  ;;  %v750_v25 = vpop.f32.mrb[5].mxu1 }
 0x215   :  { %v751_v26 = vadd.f32 %v857_v10, %v750_v25 }
 0x216   :  { %v814_v27 = vmax.f32 %v756_v24, 0.0 }
 0x217   :  { %v813_v28 = vmax.f32 %v751_v26, 0.0 }
 0x218   :  { %830 = vst [vmem:[#allocation4 + $0x28] sm:$0xff] %v814_v27 }
 0x219   :  { %829 = vst [vmem:[#allocation4 + $0x20] sm:$0xff] %v813_v28 }
 0x21b   :  { %v1060_v29 = vpop.f32.mrb[6].mxu1 }
 0x21c   :  { %v766_v30 = vadd.f32 %v1060_v29, %v857_v10  ;;  %v760_v31 = vpop.f32.mrb[7].mxu1 }
 0x21d   :  { %v761_v32 = vadd.f32 %v857_v10, %v760_v31 }
 0x21e   :  { %v816_v33 = vmax.f32 %v766_v30, 0.0 }
 0x21f   :  { %v815_v34 = vmax.f32 %v761_v32, 0.0 }
 0x220   :  { %832 = vst [vmem:[#allocation4 + $0x38] sm:$0xff] %v816_v33 }
 0x221   :  { %831 = vst [vmem:[#allocation4 + $0x30] sm:$0xff] %v815_v34 }
 0x22c   :  { %v1063_v35 = vpop.f32.mrb[8].mxu1 }
 0x22d   :  { %v776_v36 = vadd.f32 %v1063_v35, %v857_v10  ;;  %v770_v37 = vpop.f32.mrb[9].mxu1 }
 0x22e   :  { %v771_v38 = vadd.f32 %v857_v10, %v770_v37 }
 0x22f   :  { %v818_v39 = vmax.f32 %v776_v36, 0.0 }
 0x230   :  { %v817_v40 = vmax.f32 %v771_v38, 0.0  ;;  %v1066_v41 = vpop.f32.mrb[10].mxu1 }
 0x231   :  { %834 = vst [vmem:[#allocation4 + $0x48] sm:$0xff] %v818_v39  ;;  %v786_v42 = vadd.f32 %v1066_v41, %v857_v10  ;;  %v780_v43 = vpop.f32.mrb[11].mxu1 }
 0x232   :  { %833 = vst [vmem:[#allocation4 + $0x40] sm:$0xff] %v817_v40  ;;  %v781_v44 = vadd.f32 %v857_v10, %v780_v43 }
 0x233   :  { %v820_v45 = vmax.f32 %v786_v42, 0.0 }
 0x234   :  { %v819_v46 = vmax.f32 %v781_v44, 0.0  ;;  %v1069_v47 = vpop.f32.mrb[12].mxu1 }
 0x235   :  { %836 = vst [vmem:[#allocation4 + $0x58] sm:$0xff] %v820_v45  ;;  %v796_v48 = vadd.f32 %v1069_v47, %v857_v10  ;;  %v790_v49 = vpop.f32.mrb[13].mxu1 }
 0x236   :  { %835 = vst [vmem:[#allocation4 + $0x50] sm:$0xff] %v819_v46  ;;  %v791_v50 = vadd.f32 %v857_v10, %v790_v49 }
 0x237   :  { %v822_v51 = vmax.f32 %v796_v48, 0.0 }
 0x238   :  { %v821_v52 = vmax.f32 %v791_v50, 0.0  ;;  %v1072_v53 = vpop.f32.mrb[14].mxu1 }
 0x239   :  { %838 = vst [vmem:[#allocation4 + $0x68] sm:$0xff] %v822_v51  ;;  %v806_v54 = vadd.f32 %v1072_v53, %v857_v10  ;;  %v800_v55 = vpop.f32.mrb[15].mxu1 }
 0x23a   :  { %837 = vst [vmem:[#allocation4 + $0x60] sm:$0xff] %v821_v52  ;;  %v801_v56 = vadd.f32 %v857_v10, %v800_v55 }
 0x23b   :  { %v824_v57 = vmax.f32 %v806_v54, 0.0 }
 0x23c   :  { %v823_v58 = vmax.f32 %v801_v56, 0.0 }
 0x23d   :  { %840 = vst [vmem:[#allocation4 + $0x78] sm:$0xff] %v824_v57 }
 0x23e   :  { %839 = vst [vmem:[#allocation4 + $0x70] sm:$0xff] %v823_v58 }
 0x23f   :  { %1228 = shalt.err (!%p1225_p4)
}
 0x240   :  { %s1229_s30 = scalar_lea.hbm %s1629_s5, 2048 }
 0x241   :  { %p1230_p5 = scmp.ne.s32.totalorder %s1629_s5, %s1229_s30  ;;  %p1233_p6 = scmp.lt.u32.totalorder %s1229_s30, %s1629_s5 }
 0x243   :  { %p1235_p7 = pnand %p1233_p6, %p1230_p5 }
 0x245   :  { %1238 = shalt.err (!%p1235_p7)
}
 0x246   :  { %s1245_s10 = smov 128   ;;  %s1246_s11 = smov 8  }
 0x247   :  { %852 = dma.vmem_to_hbm [thread:$0]  %s847_s26, 2048, %s1629_s5, [#allocation5], %s1245_s10, %s1245_s10, %s1246_s11  }
 0x248   :  { %1239 = dma.done.wait [#allocation5], 2048  }
 0x249   :  { %1240 = vsyncadd [#allocation5], 4294965248 }
 0x24a   :  { %856 = vsyncpa [#allocation5], 1 }

</bundles_post_ra>
